<compile_context>
chip_gen: v5e
topology: v5e:2x2
jax: 0.10.0
libtpu: 0.0.40
codegen_flags: <defaults>
</compile_context>

<pallas_src>
import functools

import jax
import jax.numpy as jnp
import numpy as np
from jax.experimental import pallas as pl
from jax.experimental.pallas import tpu as pltpu


def _ip_proj_layernorm_kernel(img_ref, w_ref, b_ref, g_ref, beta_ref,
                              out_ref, y_ref, *, num_tokens, cross_dim, eps):
    """One grid step = one batch tile, all image tokens at once.

    img_ref : (Bt, C)    bf16  image-embedding tile
    w_ref   : (C, T*D)   bf16  fused projection weight (grid-invariant -> DMA'd once)
    b_ref   : (1, T*D)   f32   fused projection bias   (grid-invariant)
    g_ref   : (1, D)     f32   LayerNorm gamma
    beta_ref: (1, D)     f32   LayerNorm beta
    out_ref : (Bt, T*D)  final dtype
    y_ref   : (Bt, T*D)  f32   VMEM scratch (bounds vreg pressure at large T*D)
    """
    # One wide MXU matmul (N = T*D, f32 accumulate) + bias, staged to VMEM.
    y_ref[...] = (
        jnp.dot(img_ref[...], w_ref[...], preferred_element_type=jnp.float32)
        + b_ref[...]
    )

    gamma = g_ref[...]   # (1, D) f32, loaded once per grid step
    beta = beta_ref[...]

    # Per-token LayerNorm on static, 128-aligned lane slices (T is small/static).
    for t in range(num_tokens):
        lo = t * cross_dim
        y = y_ref[:, lo:lo + cross_dim]                      # (Bt, D) f32
        mean = jnp.mean(y, axis=-1, keepdims=True)           # (Bt, 1)
        var = jnp.mean(y * y, axis=-1, keepdims=True) - mean * mean
        scale = jax.lax.rsqrt(var + eps) * gamma              # (Bt, D)
        out_ref[:, lo:lo + cross_dim] = (
            y * scale + (beta - mean * scale)                 # fused normalize
        ).astype(out_ref.dtype)


def init_ip_adapter_params(key, clip_dim, cross_dim, num_tokens):
    """Deterministic synthetic weights (torch layout: Linear weight is (out, in))."""
    k_w, k_b = jax.random.split(key)
    proj_w = jax.random.normal(k_w, (num_tokens * cross_dim, clip_dim), jnp.float32) * 0.02
    proj_b = jax.random.normal(k_b, (num_tokens * cross_dim,), jnp.float32) * 0.02
    ln_w = jnp.ones((cross_dim,), jnp.float32)
    ln_b = jnp.zeros((cross_dim,), jnp.float32)
    return {"proj_w": proj_w, "proj_b": proj_b, "ln_w": ln_w, "ln_b": ln_b}


def prepare_ip_adapter_params(raw, num_tokens):
    """One-time (outside jit) repack of weights into kernel-friendly fused layout."""
    TD, C = raw["proj_w"].shape
    D = TD // num_tokens
    return {
        # torch Linear weight (T*D, C) -> fused (C, T*D) bf16 for the MXU.
        "proj_w_fused": raw["proj_w"].T.astype(jnp.bfloat16),           # (C, T*D)
        "proj_b_fused": raw["proj_b"].reshape(1, TD).astype(jnp.float32),  # (1, T*D)
        "ln_w": raw["ln_w"].reshape(1, D).astype(jnp.float32),          # (1, D)
        "ln_b": raw["ln_b"].reshape(1, D).astype(jnp.float32),          # (1, D)
    }


@functools.partial(jax.jit, static_argnames=("num_tokens",))
def ip_adapter_forward(noisy_latents, timesteps, encoder_hidden_states,
                       unet_added_cond_kwargs, image_embeds, prepared_params,
                       extra=None, *, num_tokens=4):
    """JAX/Pallas equivalent of IPAdapter.forward (minus the external UNet)."""
    del noisy_latents, timesteps, unet_added_cond_kwargs  # consumed only by the UNet
    B, S, D = encoder_hidden_states.shape
    T = num_tokens
    C = image_embeds.shape[-1]
    eps = 1e-5  # torch.nn.LayerNorm default

    w = prepared_params["proj_w_fused"]     # (C, T*D) bf16
    bias = prepared_params["proj_b_fused"]  # (1, T*D) f32
    gamma = prepared_params["ln_w"]         # (1, D) f32
    beta = prepared_params["ln_b"]          # (1, D) f32

    img = image_embeds.astype(jnp.bfloat16)  # bf16 MXU path

    # When `extra` is present keep the kernel output f32 so the `ip + extra`
    # add happens in full precision (reference parity); otherwise emit the
    # final dtype straight from the kernel store (no wrapper cast pass).
    out_dtype = jnp.float32 if extra is not None else encoder_hidden_states.dtype

    # Batch tile: whole batch when small (fewest grid steps), capped at 32 so
    # the per-token (Bt, D) f32 LN temps stay well inside the vreg file.
    b_tile = B if B <= 32 else 32
    n_b_tiles = pl.cdiv(B, b_tile)

    # VMEM budget from the actual footprint (double-buffered operands + f32
    # scratch), clamped to bounds safe on every generation.
    # TODO(synk): at production v7x sizes (C~1280, T*D~8192) single-buffer the
    # fused weight (pl.Buffered(1)) or tile its N dim to stay under 64 MiB VMEM.
    out_itemsize = np.dtype(out_dtype).itemsize
    footprint = (2 * (C * T * D * 2 + b_tile * C * 2 + T * D * 4 + 2 * D * 4
                      + b_tile * T * D * out_itemsize)
                 + b_tile * T * D * 4)
    vmem_limit = int(min(max(footprint + (4 << 20), 16 << 20), 64 << 20))

    kernel = functools.partial(_ip_proj_layernorm_kernel,
                               num_tokens=T, cross_dim=D, eps=eps)
    ip_flat = pl.pallas_call(
        kernel,
        out_shape=jax.ShapeDtypeStruct((B, T * D), out_dtype),
        grid=(n_b_tiles,),
        in_specs=[
            pl.BlockSpec((b_tile, C), lambda i: (i, 0)),   # image embeddings tile
            pl.BlockSpec((C, T * D), lambda i: (0, 0)),    # fused weight (resident)
            pl.BlockSpec((1, T * D), lambda i: (0, 0)),    # fused bias (resident)
            pl.BlockSpec((1, D), lambda i: (0, 0)),        # gamma (resident)
            pl.BlockSpec((1, D), lambda i: (0, 0)),        # beta (resident)
        ],
        out_specs=pl.BlockSpec((b_tile, T * D), lambda i: (i, 0)),
        scratch_shapes=[pltpu.VMEM((b_tile, T * D), jnp.float32)],
        compiler_params=pltpu.CompilerParams(
            dimension_semantics=("parallel",),
            vmem_limit_bytes=vmem_limit,
        ),
    )(img, w, bias, gamma, beta)

    # Free row-major reshape (no transpose, no extra HBM pass).
    ip = ip_flat.reshape(B, T, D)

    if extra is not None:
        ip_cast = ip.astype(encoder_hidden_states.dtype)
        extra_tokens = (ip + extra.astype(jnp.float32)).astype(encoder_hidden_states.dtype)
        ext_hidden_states = jnp.concatenate(
            [encoder_hidden_states, ip_cast, extra_tokens], axis=1)
    else:
        ext_hidden_states = jnp.concatenate([encoder_hidden_states, ip], axis=1)

    # TODO(synk): self.unet (external SDXL diffusion UNet sub-module) has no clean
    # in-scope Pallas equivalent; we return the IP-Adapter-extended hidden states
    # that would be fed to it instead of noise_pred.
    return ext_hidden_states


def _reference_forward(encoder_hidden_states, image_embeds, params, extra, T):
    """Plain-JAX reference (bf16-rounded matmul operands to mirror the kernel)."""
    B = image_embeds.shape[0]
    D = encoder_hidden_states.shape[-1]
    w = params["proj_w"].astype(jnp.bfloat16).astype(jnp.float32)
    x = image_embeds.astype(jnp.bfloat16).astype(jnp.float32)
    y = x @ w.T + params["proj_b"]
    y = y.reshape(B, T, D)
    mean = y.mean(-1, keepdims=True)
    var = ((y - mean) ** 2).mean(-1, keepdims=True)
    ip = (y - mean) / jnp.sqrt(var + 1e-5) * params["ln_w"] + params["ln_b"]
    if extra is not None:
        return jnp.concatenate([encoder_hidden_states, ip, ip + extra], axis=1)
    return jnp.concatenate([encoder_hidden_states, ip], axis=1)


if __name__ == "__main__":
    key = jax.random.PRNGKey(0)
    k0, k1, k2, k3, k4 = jax.random.split(key, 5)

    # Small shapes consistent with the forward signature (D lane-aligned).
    B, S, D = 2, 8, 128       # batch, text seq len, cross-attention dim
    C_CLIP = 32               # clip embedding dim
    T = 4                     # clip_extra_context_tokens

    noisy_latents = jax.random.normal(k0, (B, 4, 16, 16), jnp.float32)   # NCHW (UNet input)
    timesteps = jnp.array([10, 500], jnp.int32)
    encoder_hidden_states = jax.random.normal(k1, (B, S, D), jnp.float32)
    image_embeds = jax.random.normal(k2, (B, C_CLIP), jnp.float32)
    extra = jax.random.normal(k3, (B, T, D), jnp.float32)
    unet_added_cond_kwargs = {}   # only consumed by the external UNet

    raw_params = init_ip_adapter_params(k4, C_CLIP, D, T)
    params = prepare_ip_adapter_params(raw_params, T)   # one-time repack, outside jit

    # Path with `extra`
    out_extra = ip_adapter_forward(noisy_latents, timesteps, encoder_hidden_states,
                                   unet_added_cond_kwargs, image_embeds, params,
                                   extra=extra, num_tokens=T)
    out_extra = jax.block_until_ready(out_extra)

    # Path without `extra`
    out_plain = ip_adapter_forward(noisy_latents, timesteps, encoder_hidden_states,
                                   unet_added_cond_kwargs, image_embeds, params,
                                   extra=None, num_tokens=T)
    out_plain = jax.block_until_ready(out_plain)

    # Sanity check against a plain-JAX reference.
    ref_extra = _reference_forward(encoder_hidden_states, image_embeds, raw_params, extra, T)
    ref_plain = _reference_forward(encoder_hidden_states, image_embeds, raw_params, None, T)
    np.testing.assert_allclose(np.asarray(out_extra), np.asarray(ref_extra), rtol=1e-2, atol=1e-2)
    np.testing.assert_allclose(np.asarray(out_plain), np.asarray(ref_plain), rtol=1e-2, atol=1e-2)
    assert out_extra.shape == (B, S + 2 * T, D)
    assert out_plain.shape == (B, S + T, D)

    print("KERNEL_OK")
</pallas_src>

<mosaic_0001>
module attributes {stable_mosaic.version = 11 : i64} {
  func.func @_ip_proj_layernorm_kernel(%arg0: i32, %arg1: memref<2x32xbf16, #tpu.memory_space<vmem>>, %arg2: memref<32x512xbf16, #tpu.memory_space<vmem>>, %arg3: memref<1x512xf32, #tpu.memory_space<vmem>>, %arg4: memref<1x128xf32, #tpu.memory_space<vmem>>, %arg5: memref<1x128xf32, #tpu.memory_space<vmem>>, %arg6: memref<2x512xf32, #tpu.memory_space<vmem>>, %arg7: memref<2x512xf32, #tpu.memory_space<vmem>>) attributes {dimension_semantics = [#tpu.dimension_semantics<parallel>], iteration_bounds = array<i64: 1>, scalar_prefetch = 0 : i64, scratch_operands = 1 : i64, tpu.core_type = #tpu.core_type<tc>, window_params = [{transform_indices = @transform_0, window_bounds = array<i64: 2, 32>}, {pipeline_mode = #tpu.pipeline_mode<synchronous>, transform_indices = @transform_1, window_bounds = array<i64: 32, 512>}, {pipeline_mode = #tpu.pipeline_mode<synchronous>, transform_indices = @transform_2, window_bounds = array<i64: 1, 512>}, {pipeline_mode = #tpu.pipeline_mode<synchronous>, transform_indices = @transform_3, window_bounds = array<i64: 1, 128>}, {pipeline_mode = #tpu.pipeline_mode<synchronous>, transform_indices = @transform_4, window_bounds = array<i64: 1, 128>}, {transform_indices = @transform_5, window_bounds = array<i64: 2, 512>}]} {
    %c0 = arith.constant 0 : index
    %c0_0 = arith.constant 0 : index
    %0 = vector.load %arg1[%c0, %c0_0] : memref<2x32xbf16, #tpu.memory_space<vmem>>, vector<2x32xbf16>
    %c0_1 = arith.constant 0 : index
    %c0_2 = arith.constant 0 : index
    %1 = vector.load %arg2[%c0_1, %c0_2] : memref<32x512xbf16, #tpu.memory_space<vmem>>, vector<32x512xbf16>
    %cst = arith.constant dense<0.000000e+00> : vector<2x512xf32>
    %2 = tpu.matmul %0, %1, %cst {dimension_numbers = #tpu.dot_dimension_numbers<[1], [0], [0], [1], [0, 0, 1, 1], [], []>} : vector<2x32xbf16>, vector<32x512xbf16>, vector<2x512xf32> -> vector<2x512xf32>
    %c0_3 = arith.constant 0 : index
    %c0_4 = arith.constant 0 : index
    %3 = vector.load %arg3[%c0_3, %c0_4] : memref<1x512xf32, #tpu.memory_space<vmem>>, vector<1x512xf32>
    %4 = vector.broadcast %3 : vector<1x512xf32> to vector<2x512xf32>
    %5 = arith.addf %2, %4 : vector<2x512xf32>
    %c0_5 = arith.constant 0 : index
    %c0_6 = arith.constant 0 : index
    %6 = vector.load %arg7[%c0_5, %c0_6] : memref<2x512xf32, #tpu.memory_space<vmem>>, vector<2x512xf32>
    tpu.vector_store %arg7[%c0_5, %c0_6], %5 {strides = array<i32>} : memref<2x512xf32, #tpu.memory_space<vmem>>, vector<2x512xf32>,
    %c0_7 = arith.constant 0 : index
    %c0_8 = arith.constant 0 : index
    %7 = vector.load %arg4[%c0_7, %c0_8] : memref<1x128xf32, #tpu.memory_space<vmem>>, vector<1x128xf32>
    %c0_9 = arith.constant 0 : index
    %c0_10 = arith.constant 0 : index
    %8 = vector.load %arg5[%c0_9, %c0_10] : memref<1x128xf32, #tpu.memory_space<vmem>>, vector<1x128xf32>
    %c0_11 = arith.constant 0 : index
    %c0_12 = arith.constant 0 : index
    %9 = vector.load %arg7[%c0_11, %c0_12] : memref<2x512xf32, #tpu.memory_space<vmem>>, vector<2x128xf32>
    %cst_13 = arith.constant dense<0.000000e+00> : vector<2xf32>
    %10 = vector.multi_reduction <add>, %9, %cst_13 [1] : vector<2x128xf32> to vector<2xf32>
    %11 = vector.shape_cast %10 : vector<2xf32> to vector<2x1xf32>
    %cst_14 = arith.constant 1.280000e+02 : f32
    %12 = vector.broadcast %cst_14 : f32 to vector<2x1xf32>
    %13 = arith.divf %11, %12 : vector<2x1xf32>
    %14 = arith.mulf %9, %9 : vector<2x128xf32>
    %cst_15 = arith.constant dense<0.000000e+00> : vector<2xf32>
    %15 = vector.multi_reduction <add>, %14, %cst_15 [1] : vector<2x128xf32> to vector<2xf32>
    %16 = vector.shape_cast %15 : vector<2xf32> to vector<2x1xf32>
    %cst_16 = arith.constant 1.280000e+02 : f32
    %17 = vector.broadcast %cst_16 : f32 to vector<2x1xf32>
    %18 = arith.divf %16, %17 : vector<2x1xf32>
    %19 = arith.mulf %13, %13 : vector<2x1xf32>
    %20 = arith.subf %18, %19 : vector<2x1xf32>
    %cst_17 = arith.constant 9.99999974E-6 : f32
    %21 = vector.broadcast %cst_17 : f32 to vector<2x1xf32>
    %22 = arith.addf %20, %21 : vector<2x1xf32>
    %23 = math.rsqrt %22 : vector<2x1xf32>
    %24 = vector.broadcast %23 : vector<2x1xf32> to vector<2x128xf32>
    %25 = vector.broadcast %7 : vector<1x128xf32> to vector<2x128xf32>
    %26 = arith.mulf %24, %25 : vector<2x128xf32>
    %27 = arith.mulf %9, %26 : vector<2x128xf32>
    %28 = vector.broadcast %13 : vector<2x1xf32> to vector<2x128xf32>
    %29 = arith.mulf %28, %26 : vector<2x128xf32>
    %30 = vector.broadcast %8 : vector<1x128xf32> to vector<2x128xf32>
    %31 = arith.subf %30, %29 : vector<2x128xf32>
    %32 = arith.addf %27, %31 : vector<2x128xf32>
    %c0_18 = arith.constant 0 : index
    %c0_19 = arith.constant 0 : index
    %33 = vector.load %arg6[%c0_18, %c0_19] : memref<2x512xf32, #tpu.memory_space<vmem>>, vector<2x128xf32>
    tpu.vector_store %arg6[%c0_18, %c0_19], %32 {strides = array<i32>} : memref<2x512xf32, #tpu.memory_space<vmem>>, vector<2x128xf32>,
    %c0_20 = arith.constant 0 : index
    %c128 = arith.constant 128 : index
    %34 = vector.load %arg7[%c0_20, %c128] : memref<2x512xf32, #tpu.memory_space<vmem>>, vector<2x128xf32>
    %cst_21 = arith.constant dense<0.000000e+00> : vector<2xf32>
    %35 = vector.multi_reduction <add>, %34, %cst_21 [1] : vector<2x128xf32> to vector<2xf32>
    %36 = vector.shape_cast %35 : vector<2xf32> to vector<2x1xf32>
    %cst_22 = arith.constant 1.280000e+02 : f32
    %37 = vector.broadcast %cst_22 : f32 to vector<2x1xf32>
    %38 = arith.divf %36, %37 : vector<2x1xf32>
    %39 = arith.mulf %34, %34 : vector<2x128xf32>
    %cst_23 = arith.constant dense<0.000000e+00> : vector<2xf32>
    %40 = vector.multi_reduction <add>, %39, %cst_23 [1] : vector<2x128xf32> to vector<2xf32>
    %41 = vector.shape_cast %40 : vector<2xf32> to vector<2x1xf32>
    %cst_24 = arith.constant 1.280000e+02 : f32
    %42 = vector.broadcast %cst_24 : f32 to vector<2x1xf32>
    %43 = arith.divf %41, %42 : vector<2x1xf32>
    %44 = arith.mulf %38, %38 : vector<2x1xf32>
    %45 = arith.subf %43, %44 : vector<2x1xf32>
    %cst_25 = arith.constant 9.99999974E-6 : f32
    %46 = vector.broadcast %cst_25 : f32 to vector<2x1xf32>
    %47 = arith.addf %45, %46 : vector<2x1xf32>
    %48 = math.rsqrt %47 : vector<2x1xf32>
    %49 = vector.broadcast %48 : vector<2x1xf32> to vector<2x128xf32>
    %50 = vector.broadcast %7 : vector<1x128xf32> to vector<2x128xf32>
    %51 = arith.mulf %49, %50 : vector<2x128xf32>
    %52 = arith.mulf %34, %51 : vector<2x128xf32>
    %53 = vector.broadcast %38 : vector<2x1xf32> to vector<2x128xf32>
    %54 = arith.mulf %53, %51 : vector<2x128xf32>
    %55 = vector.broadcast %8 : vector<1x128xf32> to vector<2x128xf32>
    %56 = arith.subf %55, %54 : vector<2x128xf32>
    %57 = arith.addf %52, %56 : vector<2x128xf32>
    %c0_26 = arith.constant 0 : index
    %c128_27 = arith.constant 128 : index
    %58 = vector.load %arg6[%c0_26, %c128_27] : memref<2x512xf32, #tpu.memory_space<vmem>>, vector<2x128xf32>
    tpu.vector_store %arg6[%c0_26, %c128_27], %57 {strides = array<i32>} : memref<2x512xf32, #tpu.memory_space<vmem>>, vector<2x128xf32>,
    %c0_28 = arith.constant 0 : index
    %c256 = arith.constant 256 : index
    %59 = vector.load %arg7[%c0_28, %c256] : memref<2x512xf32, #tpu.memory_space<vmem>>, vector<2x128xf32>
    %cst_29 = arith.constant dense<0.000000e+00> : vector<2xf32>
    %60 = vector.multi_reduction <add>, %59, %cst_29 [1] : vector<2x128xf32> to vector<2xf32>
    %61 = vector.shape_cast %60 : vector<2xf32> to vector<2x1xf32>
    %cst_30 = arith.constant 1.280000e+02 : f32
    %62 = vector.broadcast %cst_30 : f32 to vector<2x1xf32>
    %63 = arith.divf %61, %62 : vector<2x1xf32>
    %64 = arith.mulf %59, %59 : vector<2x128xf32>
    %cst_31 = arith.constant dense<0.000000e+00> : vector<2xf32>
    %65 = vector.multi_reduction <add>, %64, %cst_31 [1] : vector<2x128xf32> to vector<2xf32>
    %66 = vector.shape_cast %65 : vector<2xf32> to vector<2x1xf32>
    %cst_32 = arith.constant 1.280000e+02 : f32
    %67 = vector.broadcast %cst_32 : f32 to vector<2x1xf32>
    %68 = arith.divf %66, %67 : vector<2x1xf32>
    %69 = arith.mulf %63, %63 : vector<2x1xf32>
    %70 = arith.subf %68, %69 : vector<2x1xf32>
    %cst_33 = arith.constant 9.99999974E-6 : f32
    %71 = vector.broadcast %cst_33 : f32 to vector<2x1xf32>
    %72 = arith.addf %70, %71 : vector<2x1xf32>
    %73 = math.rsqrt %72 : vector<2x1xf32>
    %74 = vector.broadcast %73 : vector<2x1xf32> to vector<2x128xf32>
    %75 = vector.broadcast %7 : vector<1x128xf32> to vector<2x128xf32>
    %76 = arith.mulf %74, %75 : vector<2x128xf32>
    %77 = arith.mulf %59, %76 : vector<2x128xf32>
    %78 = vector.broadcast %63 : vector<2x1xf32> to vector<2x128xf32>
    %79 = arith.mulf %78, %76 : vector<2x128xf32>
    %80 = vector.broadcast %8 : vector<1x128xf32> to vector<2x128xf32>
    %81 = arith.subf %80, %79 : vector<2x128xf32>
    %82 = arith.addf %77, %81 : vector<2x128xf32>
    %c0_34 = arith.constant 0 : index
    %c256_35 = arith.constant 256 : index
    %83 = vector.load %arg6[%c0_34, %c256_35] : memref<2x512xf32, #tpu.memory_space<vmem>>, vector<2x128xf32>
    tpu.vector_store %arg6[%c0_34, %c256_35], %82 {strides = array<i32>} : memref<2x512xf32, #tpu.memory_space<vmem>>, vector<2x128xf32>,
    %c0_36 = arith.constant 0 : index
    %c384 = arith.constant 384 : index
    %84 = vector.load %arg7[%c0_36, %c384] : memref<2x512xf32, #tpu.memory_space<vmem>>, vector<2x128xf32>
    %cst_37 = arith.constant dense<0.000000e+00> : vector<2xf32>
    %85 = vector.multi_reduction <add>, %84, %cst_37 [1] : vector<2x128xf32> to vector<2xf32>
    %86 = vector.shape_cast %85 : vector<2xf32> to vector<2x1xf32>
    %cst_38 = arith.constant 1.280000e+02 : f32
    %87 = vector.broadcast %cst_38 : f32 to vector<2x1xf32>
    %88 = arith.divf %86, %87 : vector<2x1xf32>
    %89 = arith.mulf %84, %84 : vector<2x128xf32>
    %cst_39 = arith.constant dense<0.000000e+00> : vector<2xf32>
    %90 = vector.multi_reduction <add>, %89, %cst_39 [1] : vector<2x128xf32> to vector<2xf32>
    %91 = vector.shape_cast %90 : vector<2xf32> to vector<2x1xf32>
    %cst_40 = arith.constant 1.280000e+02 : f32
    %92 = vector.broadcast %cst_40 : f32 to vector<2x1xf32>
    %93 = arith.divf %91, %92 : vector<2x1xf32>
    %94 = arith.mulf %88, %88 : vector<2x1xf32>
    %95 = arith.subf %93, %94 : vector<2x1xf32>
    %cst_41 = arith.constant 9.99999974E-6 : f32
    %96 = vector.broadcast %cst_41 : f32 to vector<2x1xf32>
    %97 = arith.addf %95, %96 : vector<2x1xf32>
    %98 = math.rsqrt %97 : vector<2x1xf32>
    %99 = vector.broadcast %98 : vector<2x1xf32> to vector<2x128xf32>
    %100 = vector.broadcast %7 : vector<1x128xf32> to vector<2x128xf32>
    %101 = arith.mulf %99, %100 : vector<2x128xf32>
    %102 = arith.mulf %84, %101 : vector<2x128xf32>
    %103 = vector.broadcast %88 : vector<2x1xf32> to vector<2x128xf32>
    %104 = arith.mulf %103, %101 : vector<2x128xf32>
    %105 = vector.broadcast %8 : vector<1x128xf32> to vector<2x128xf32>
    %106 = arith.subf %105, %104 : vector<2x128xf32>
    %107 = arith.addf %102, %106 : vector<2x128xf32>
    %c0_42 = arith.constant 0 : index
    %c384_43 = arith.constant 384 : index
    %108 = vector.load %arg6[%c0_42, %c384_43] : memref<2x512xf32, #tpu.memory_space<vmem>>, vector<2x128xf32>
    tpu.vector_store %arg6[%c0_42, %c384_43], %107 {strides = array<i32>} : memref<2x512xf32, #tpu.memory_space<vmem>>, vector<2x128xf32>,
    return
  }
  func.func @transform_0(%arg0: i32) -> (i32, i32) {
    %c0_i32 = arith.constant 0 : i32
    %c0_i32_0 = arith.constant 0 : i32
    return %arg0, %c0_i32 : i32, i32
  }
  func.func @transform_1(%arg0: i32) -> (i32, i32) {
    %c0_i32 = arith.constant 0 : i32
    %c0_i32_0 = arith.constant 0 : i32
    %c0_i32_1 = arith.constant 0 : i32
    return %c0_i32, %c0_i32_0 : i32, i32
  }
  func.func @transform_2(%arg0: i32) -> (i32, i32) {
    %c0_i32 = arith.constant 0 : i32
    %c0_i32_0 = arith.constant 0 : i32
    %c0_i32_1 = arith.constant 0 : i32
    return %c0_i32, %c0_i32_0 : i32, i32
  }
  func.func @transform_3(%arg0: i32) -> (i32, i32) {
    %c0_i32 = arith.constant 0 : i32
    %c0_i32_0 = arith.constant 0 : i32
    %c0_i32_1 = arith.constant 0 : i32
    return %c0_i32, %c0_i32_0 : i32, i32
  }
  func.func @transform_4(%arg0: i32) -> (i32, i32) {
    %c0_i32 = arith.constant 0 : i32
    %c0_i32_0 = arith.constant 0 : i32
    %c0_i32_1 = arith.constant 0 : i32
    return %c0_i32, %c0_i32_0 : i32, i32
  }
  func.func @transform_5(%arg0: i32) -> (i32, i32) {
    %c0_i32 = arith.constant 0 : i32
    %c0_i32_0 = arith.constant 0 : i32
    return %arg0, %c0_i32 : i32, i32
  }
}

</mosaic_0001>

<bundles_post_ra>
// kernel: ip_adapter_forward.1
= control target key start
LH: loop header
LB: loop body
LE: loop exit
PB: predicated region body
PF: predicated region fallthrough
CT: control target
= control target key end

     0   :  { %10 = vsyncpa [#allocation4], 0  ;;  %s389_s21 = smov [#allocation3]   ;;  %s390_s23 = smov 256   ;;  %s493_s0 = inlined_call_operand.vmem [shape: bf16[2,32], index: 0, kind: input, shape index: {}]   ;;  %s494_s1 = inlined_call_operand.hbm [shape: bf16[32,512], index: 1, kind: input, shape index: {}]   ;;  %s495_s2 = inlined_call_operand.vmem [shape: f32[1,512], index: 2, kind: input, shape index: {}]   ;;  %s496_s3 = inlined_call_operand.vmem [shape: f32[1,128], index: 3, kind: input, shape index: {}]   ;;  %s497_s4 = inlined_call_operand.vmem [shape: f32[1,128], index: 4, kind: input, shape index: {}]   ;;  %s498_s5 = inlined_call_operand.vmem [shape: f32[2,512], index: 5, kind: output, shape index: {}]  }
   0x1   :  { %s17_s20 = sshll.u32 %s494_s1, 4  ;;  %s19_s22 = sshll.u32 %s389_s21, 4  ;;  %s18_s20 = int_to_ptr.hbm [resolvable:$true] %s17_s20  ;;  %s20_s22 = int_to_ptr.vmem [resolvable:$true] %s19_s22 }
   0x2   :  { %s391_s24 = smov 16  }
   0x3   :  { %25 = dma.hbm_to_vmem [thread:$0]  %s18_s20, 1024, %s20_s22, [#allocation4], %s390_s23, %s390_s23, %s391_s24  }
   0x4   :  { %387 = dma.done.wait [#allocation4], 1024  }
   0x5   :  { %388 = vsyncadd [#allocation4], 4294966272  ;;  %v321_v0 = vld [vmem:[#allocation3 + $0x20] sm:$0xf]  ;;  %v345_v1 = vld [vmem:[#allocation3 + $0x2c] sm:$0xf0] }
   0x6   :  { %v343_v2 = vld [vmem:[#allocation3 + $0x24] sm:$0xf]  ;;  %v322_v3 = vor.u32 %v345_v1, %v321_v0  ;;  %v323_v4 = vld [vmem:[#allocation3 + $0x30] sm:$0xf0]  ;;  %v329_v5 = vld [vmem:[#allocation3 + $0x28] sm:$0xf] }
   0x7   :  { %v346_v6 = vld [vmem:[#allocation3 + $0x34] sm:$0xf0]  ;;  %v326_v7 = vor.u32 %v343_v2, %v323_v4  ;;  %v344_v9 = vld [vmem:[#allocation3 + $0x2c] sm:$0xf]  ;;  %v331_v10 = vld [vmem:[#allocation3 + $0x38] sm:$0xf0] }
   0x8   :  { %v330_v8 = vor.u32 %v346_v6, %v329_v5  ;;  %v305_v11 = vld [vmem:[#allocation3] sm:$0xf]  ;;  %106 = vmatpush.bf16.msra.mxu0 %v322_v3  ;;  %v334_v12 = vor.u32 %v344_v9, %v331_v10  ;;  %v341_v13 = vld [vmem:[#allocation3 + $0xc] sm:$0xf0]  ;;  %v339_v14 = vld [vmem:[#allocation3 + $0x4] sm:$0xf] }
   0x9   :  { %v307_v15 = vld [vmem:[#allocation3 + $0x10] sm:$0xf0]  ;;  %119 = vmatpush.bf16.msra.mxu1 %v326_v7  ;;  %v306_v16 = vor.u32 %v341_v13, %v305_v11  ;;  %v313_v18 = vld [vmem:[#allocation3 + $0x8] sm:$0xf]  ;;  %v342_v19 = vld [vmem:[#allocation3 + $0x14] sm:$0xf0] }
   0xa   :  { %132 = vmatpush.bf16.msra.mxu2 %v330_v8  ;;  %v310_v17 = vor.u32 %v339_v14, %v307_v15  ;;  %v340_v20 = vld [vmem:[#allocation3 + $0xc] sm:$0xf]  ;;  %145 = vmatpush.bf16.msra.mxu3 %v334_v12  ;;  %v314_v21 = vor.u32 %v342_v19, %v313_v18  ;;  %v315_v22 = vld [vmem:[#allocation3 + $0x18] sm:$0xf0]  ;;  %v37_v24 = vld [vmem:[%s493_s0] sm:$0x1] }
   0xb   :  { %v318_v23 = vor.u32 %v340_v20, %v315_v22  ;;  %vm96_vm0 = vcmask 261120   ;;  %v46_v25 = vld [vmem:[%s495_s2] sm:$0xf]  ;;  %vm159_vm1 = vcmask 1041408   ;;  %vm161_vm2 = vcmask 1045508  }
   0xc   :  { %107 = vmatpush.bf16.msra.mxu0 %v306_v16  ;;  %v49_v26 = vperm.slane %v46_v25, 1  ;;  %v48_v29 = vperm.slane %v46_v25, 0  ;;  %v50_v31 = vperm.slane %v46_v25, 2  ;;  %v51_v32 = vperm.slane %v46_v25, 3 }
   0xd   :  { %120 = vmatpush.bf16.msra.mxu1 %v310_v17  ;;  %vm163_vm3 = vcmask 1043456   ;;  %v392_v0 = vmov 128.0  }
   0xe   :  { %133 = vmatpush.bf16.msra.mxu2 %v314_v21  ;;  %146 = vmatpush.bf16.msra.mxu3 %v318_v23  ;;  %353 = vrcp.f32 %v392_v0 }
   0xf   :  { %335 = vmatmul.msk.bf16.vlgmr.msra.gmra.mxu0 %vm96_vm0, %v37_v24 }
  0x10   :  { %336 = vmatmul.msk.bf16.vlgmr.msra.gmra.mxu1 %vm96_vm0, %v37_v24 }
  0x11   :  { %337 = vmatmul.msk.bf16.vlgmr.msra.gmra.mxu2 %vm96_vm0, %v37_v24  ;;  %338 = vmatmul.msk.bf16.vlgmr.msra.gmra.mxu3 %vm96_vm0, %v37_v24 }
  0x14   :  { %v354_v1 = vpop.eup %353 }
  0x15   :  { %v174_v2 = vmul.f32 128.0, %v354_v1  ;;  %vm178_vm4 = vweird.f32 %v354_v1 }
  0x17   :  { %v175_v3 = vsub.f32 1.0, %v174_v2 }
  0x19   :  { %v176_v4 = vmul.f32 %v354_v1, %v175_v3 }
  0x1b   :  { %v177_v5 = vadd.f32 %v354_v1, %v176_v4 }
  0x1d   :  { %v179_v6 = vsel %vm178_vm4, %v354_v1, %v177_v5 }
  0x8c   :  { %v109_v27 = vpop.f32.mrf.mxu0 }
  0x8d   :  { %v122_v28 = vpop.f32.mrf.mxu1  ;;  %v110_v33 = vadd.f32 %v109_v27, %v48_v29 }
  0x8e   :  { %v123_v30 = vadd.f32 %v122_v28, %v49_v26 }
  0x90   :  { %v156_v34 = vrot.slane %v123_v30, 6 }
  0x92   :  { %v160_v42 = vsel %vm159_vm1, %v110_v33, %v156_v34 }
  0x94   :  { %v135_v35 = vpop.f32.mrf.mxu2  ;;  %v148_v37 = vpop.f32.mrf.mxu3 }
  0x95   :  { %v136_v36 = vadd.f32 %v135_v35, %v50_v31  ;;  %v111_v38 = vpop.f32.mrf.mxu0  ;;  %v149_v39 = vadd.f32 %v148_v37, %v51_v32  ;;  %v124_v40 = vpop.f32.mrf.mxu1 }
  0x97   :  { %v157_v41 = vrot.slane %v136_v36, 4  ;;  %v158_v43 = vrot.slane %v149_v39, 2 }
  0x99   :  { %v162_v44 = vsel %vm161_vm2, %v157_v41, %v158_v43  ;;  %v351_v41 = vld [vmem:[%s496_s3] ss:$0 sm:$0xff] }
  0x9a   :  { %v164_v45 = vsel %vm163_vm3, %v160_v42, %v162_v44 }
  0x9b   :  { %166 = vst [vmem:[#allocation2] sm:$0xff] %v164_v45 }
  0x9c   :  { %v137_v46 = vpop.f32.mrf.mxu2  ;;  %v150_v47 = vpop.f32.mrf.mxu3 }
  0x9d   :  { %v352_v46 = vld [vmem:[%s497_s4] ss:$0 sm:$0xff] }
  0xa2   :  { %v433_v48 = vld [vmem:[#allocation2 + $0x4] sm:$0x3]  ;;  %v435_v49 = vld [vmem:[#allocation2] sm:$0x3]  ;;  %v444_v54 = vld [vmem:[#allocation2 + $0x2] sm:$0x3] }
  0xa3   :  { %v241_v50 = vsel %vm159_vm1, %v433_v48, 0.0  ;;  %v170_v51 = vsel %vm159_vm1, %v435_v49, 0.0  ;;  %v181_v52 = vmul.f32 %v435_v49, %v435_v49  ;;  %v446_v55 = vld [vmem:[#allocation2 + $0x6] sm:$0x3]  ;;  %v216_v56 = vmul.f32 %v444_v54, %v444_v54 }
  0xa4   :  { %242 = vadd.xlane.f32.xlu1 %v241_v50  ;;  %171 = vadd.xlane.f32.xlu0 %v170_v51  ;;  %v270_v57 = vsel %vm159_vm1, %v446_v55, 0.0  ;;  %v212_v58 = vsel %vm159_vm1, %v444_v54, 0.0  ;;  %v274_v60 = vmul.f32 %v446_v55, %v446_v55  ;;  %v245_v61 = vmul.f32 %v433_v48, %v433_v48 }
  0xa5   :  { %v182_v53 = vsel %vm159_vm1, %v181_v52, 0.0  ;;  %v217_v59 = vsel %vm159_vm1, %v216_v56, 0.0 }
  0xa6   :  { %183 = vadd.xlane.f32.xlu2 %v182_v53  ;;  %v275_v62 = vsel %vm159_vm1, %v274_v60, 0.0  ;;  %v246_v63 = vsel %vm159_vm1, %v245_v61, 0.0 }
  0xac   :  { %271 = vadd.xlane.f32.xlu1 %v270_v57  ;;  %213 = vadd.xlane.f32.xlu0 %v212_v58 }
  0xae   :  { %218 = vadd.xlane.f32.xlu2 %v217_v59 }
  0xb4   :  { %276 = vadd.xlane.f32.xlu1 %v275_v62  ;;  %247 = vadd.xlane.f32.xlu0 %v246_v63 }
 0x117   :  { %v243_v7 = vpop.xlane.xlu1 %242  ;;  %v172_v8 = vpop.xlane.xlu0 %171 }
 0x118   :  { %v180_v9 = vmul.f32 %v179_v6, %v172_v8  ;;  %v461_v21 = vmul.f32 %v243_v7, %v179_v6 }
 0x119   :  { %v184_v10 = vpop.xlane.xlu2 %183 }
 0x11a   :  { %v186_v11 = vmul.f32 %v180_v9, %v180_v9  ;;  %v185_v12 = vmul.f32 %v184_v10, %v179_v6  ;;  %v250_v26 = vmul.f32 %v461_v21, %v461_v21 }
 0x11c   :  { %v187_v13 = vsub.f32 %v185_v12, %v186_v11 }
 0x11e   :  { %v188_v14 = vadd.f32 1e-05, %v187_v13 }
 0x11f   :  { %v272_v15 = vpop.xlane.xlu1 %271  ;;  %v214_v16 = vpop.xlane.xlu0 %213 }
 0x120   :  { %355 = vrsqrt.f32 %v188_v14  ;;  %v215_v17 = vmul.f32 %v214_v16, %v179_v6  ;;  %v463_v22 = vmul.f32 %v272_v15, %v179_v6  ;;  %vm195_vm6 = vweird.f32 %v188_v14 }
 0x121   :  { %v219_v18 = vpop.xlane.xlu2 %218 }
 0x122   :  { %v221_v19 = vmul.f32 %v215_v17, %v215_v17  ;;  %v220_v20 = vmul.f32 %v219_v18, %v179_v6  ;;  %v279_v30 = vmul.f32 %v463_v22, %v463_v22 }
 0x124   :  { %v222_v23 = vsub.f32 %v220_v20, %v221_v19 }
 0x126   :  { %v356_v24 = vpop.eup %355  ;;  %v223_v25 = vadd.f32 1e-05, %v222_v23 }
 0x127   :  { %v190_v27 = vmul.f32 %v356_v24, %v188_v14  ;;  %v277_v28 = vpop.xlane.xlu1 %276  ;;  %v248_v29 = vpop.xlane.xlu0 %247  ;;  %vm196_vm5 = vweird.f32 %v356_v24 }
 0x128   :  { %357 = vrsqrt.f32 %v223_v25  ;;  %v278_v31 = vmul.f32 %v277_v28, %v179_v6  ;;  %v249_v32 = vmul.f32 %v248_v29, %v179_v6  ;;  %vm197_vm7 = vmor %vm195_vm6, %vm196_vm5  ;;  %vm230_vm9 = vweird.f32 %v223_v25 }
 0x129   :  { %v191_v33 = vmul.f32 %v356_v24, %v190_v27 }
 0x12a   :  { %v280_v34 = vsub.f32 %v278_v31, %v279_v30  ;;  %v251_v35 = vsub.f32 %v249_v32, %v250_v26 }
 0x12b   :  { %v192_v36 = vmul.f32 0.5, %v191_v33 }
 0x12c   :  { %v281_v37 = vadd.f32 1e-05, %v280_v34  ;;  %v252_v38 = vadd.f32 1e-05, %v251_v35 }
 0x12d   :  { %v193_v39 = vsub.f32 1.5, %v192_v36 }
 0x12e   :  { %v358_v40 = vpop.eup %357  ;;  %359 = vrsqrt.f32 %v281_v37  ;;  %vm288_vm13 = vweird.f32 %v281_v37  ;;  %vm259_vm15 = vweird.f32 %v252_v38 }
 0x12f   :  { %v194_v42 = vmul.f32 %v356_v24, %v193_v39  ;;  %v225_v43 = vmul.f32 %v358_v40, %v223_v25  ;;  %361 = vrsqrt.f32 %v252_v38  ;;  %vm231_vm8 = vweird.f32 %v358_v40 }
 0x130   :  { %vm232_vm10 = vmor %vm230_vm9, %vm231_vm8 }
 0x131   :  { %v198_v44 = vsel %vm197_vm7, %v356_v24, %v194_v42  ;;  %v226_v45 = vmul.f32 %v358_v40, %v225_v43 }
 0x132   :  { %v202_v47 = vmul.f32 %v351_v41, %v198_v44 }
 0x133   :  { %v227_v50 = vmul.f32 0.5, %v226_v45 }
 0x134   :  { %v360_v51 = vpop.eup %359  ;;  %v204_v52 = vmul.f32 %v202_v47, %v180_v9  ;;  %v203_v58 = vmul.f32 %v202_v47, %v435_v49 }
 0x135   :  { %v362_v53 = vpop.eup %361  ;;  %v228_v56 = vsub.f32 1.5, %v227_v50  ;;  %v283_v57 = vmul.f32 %v360_v51, %v281_v37  ;;  %vm289_vm11 = vweird.f32 %v360_v51 }
 0x136   :  { %v208_v59 = vsub.f32 %v352_v46, %v204_v52  ;;  %v254_v60 = vmul.f32 %v362_v53, %v252_v38  ;;  %vm260_vm12 = vweird.f32 %v362_v53  ;;  %vm290_vm14 = vmor %vm288_vm13, %vm289_vm11 }
 0x137   :  { %v229_v61 = vmul.f32 %v358_v40, %v228_v56  ;;  %v284_v62 = vmul.f32 %v360_v51, %v283_v57  ;;  %vm261_vm0 = vmor %vm259_vm15, %vm260_vm12 }
 0x138   :  { %v209_v63 = vadd.f32 %v208_v59, %v203_v58  ;;  %v255_v0 = vmul.f32 %v362_v53, %v254_v60 }
 0x139   :  { %v233_v1 = vsel %vm232_vm10, %v358_v40, %v229_v61  ;;  %v285_v2 = vmul.f32 0.5, %v284_v62 }
 0x13a   :  { %210 = vst [vmem:[%s498_s5] sm:$0x3] %v209_v63  ;;  %v234_v3 = vmul.f32 %v351_v41, %v233_v1  ;;  %v256_v4 = vmul.f32 0.5, %v255_v0 }
 0x13b   :  { %v286_v5 = vsub.f32 1.5, %v285_v2 }
 0x13c   :  { %v236_v6 = vmul.f32 %v234_v3, %v215_v17  ;;  %v257_v49 = vsub.f32 1.5, %v256_v4  ;;  %v235_v8 = vmul.f32 %v234_v3, %v444_v54 }
 0x13d   :  { %v287_v7 = vmul.f32 %v360_v51, %v286_v5 }
 0x13e   :  { %v237_v9 = vsub.f32 %v352_v46, %v236_v6  ;;  %v258_v10 = vmul.f32 %v362_v53, %v257_v49 }
 0x13f   :  { %v291_v11 = vsel %vm290_vm14, %v360_v51, %v287_v7 }
 0x140   :  { %v238_v12 = vadd.f32 %v237_v9, %v235_v8  ;;  %v292_v13 = vmul.f32 %v351_v41, %v291_v11  ;;  %v262_v14 = vsel %vm261_vm0, %v362_v53, %v258_v10 }
 0x141   :  { %v263_v15 = vmul.f32 %v351_v41, %v262_v14 }
 0x142   :  { %239 = vst [vmem:[%s498_s5 + $0x2] sm:$0x3] %v238_v12  ;;  %v294_v16 = vmul.f32 %v292_v13, %v463_v22  ;;  %v293_v54 = vmul.f32 %v292_v13, %v446_v55 }
 0x143   :  { %v265_v17 = vmul.f32 %v263_v15, %v461_v21  ;;  %v264_v19 = vmul.f32 %v263_v15, %v433_v48 }
 0x144   :  { %v295_v18 = vsub.f32 %v352_v46, %v294_v16 }
 0x145   :  { %v266_v20 = vsub.f32 %v352_v46, %v265_v17 }
 0x146   :  { %v296_v23 = vadd.f32 %v295_v18, %v293_v54 }
 0x147   :  { %v267_v24 = vadd.f32 %v266_v20, %v264_v19 }
 0x148   :  { %297 = vst [vmem:[%s498_s5 + $0x6] sm:$0x3] %v296_v23 }
 0x149   :  { %268 = vst [vmem:[%s498_s5 + $0x4] sm:$0x3] %v267_v24 }
 0x14a   :  { %302 = vsyncpa [#allocation4], 1 }

</bundles_post_ra>
